<compile_context>
chip_gen: v6e
topology: v6e:2x2x1
jax: 0.10.0
libtpu: 0.0.40
codegen_flags: <defaults>
</compile_context>

<pallas_src>
import functools

import jax
import jax.numpy as jnp
from jax.experimental import pallas as pl
from jax.experimental.pallas import tpu as pltpu

HIDDEN = 256
SUBLANE = 8          # sublane granularity for the batch tile


def _round_up(n: int, m: int) -> int:
    return ((n + m - 1) // m) * m


def _device_kind() -> str:
    try:
        return jax.devices()[0].device_kind.lower()
    except Exception:
        return ""


def _tc_per_chip() -> int:
    """Best-effort TensorCore-per-chip count (2 on v7x / megacore parts)."""
    kind = _device_kind()
    if any(tag in kind for tag in ("v7", "7x", "v4", "v5p")):
        return 2
    return 1


def _default_block_m() -> int:
    kind = _device_kind()
    # v5e: stop growing the tile around 1024 (lower HBM BW, 1 vst slot).
    if "v5e" in kind or "v5 lite" in kind or "v5lite" in kind:
        return 1024
    return 2048


def mlp_kernel(x_ref, w1_ref, b1_ref, w2_ref, b2_ref, o_ref):
    # In-kernel f32 -> bf16 cast of the input tile (saves a separate XLA pass).
    x = x_ref[...].astype(jnp.bfloat16)

    # Layer 1: Linear(obs_dim, 256) + ReLU.  bf16 MXU, f32 accumulation.
    h = jnp.dot(x, w1_ref[...], preferred_element_type=jnp.float32)
    h = jnp.maximum(h + b1_ref[...], 0.0)

    # Layer 2: feed the bf16 hidden activation straight into the second matmul
    # (no VMEM scratch round-trip), then store the un-padded f32 logits.
    out = jnp.dot(h.astype(jnp.bfloat16), w2_ref[...],
                  preferred_element_type=jnp.float32)
    o_ref[...] = (out + b2_ref[...]).astype(o_ref.dtype)


@functools.partial(jax.jit, static_argnames=("block_m",))
def mlp_forward(x, w1, b1, w2, b2, *, block_m=None):
    """x: [B, obs_dim] f32 -> [B, num_actions] f32.

    w1: [obs_dim, 256] bf16, b1: [1, 256] f32,
    w2: [256, num_actions] bf16, b2: [1, num_actions] f32.
    """
    B, D = x.shape
    H = w1.shape[1]
    A = w2.shape[1]

    if block_m is None:
        block_m = _default_block_m()
    # Batch tile: a multiple of 8, at most block_m, at most (padded) B.
    block_m = max(SUBLANE, (block_m // SUBLANE) * SUBLANE)
    tm = min(block_m, _round_up(B, SUBLANE))

    # On 2-TC chips make sure there are >= 2 grid steps so ("parallel",)
    # semantics can shard batch tiles across both TensorCores.
    if _tc_per_chip() >= 2 and _round_up(B, tm) // tm == 1 and tm >= 2 * SUBLANE:
        tm = _round_up((tm + 1) // 2, SUBLANE)

    b_pad = _round_up(B, tm)
    xi = x if b_pad == B else jnp.pad(x, ((0, b_pad - B), (0, 0)))
    grid = (b_pad // tm,)

    flops = 2 * b_pad * (D * H + H * A)
    bytes_accessed = (b_pad * D * 4            # x (f32, cast in-kernel)
                      + D * H * 2 + H * A * 2  # weights (bf16, resident)
                      + H * 4 + A * 4          # biases (f32)
                      + b_pad * A * 4)         # un-padded f32 output

    out = pl.pallas_call(
        mlp_kernel,
        out_shape=jax.ShapeDtypeStruct((b_pad, A), jnp.float32),
        grid_spec=pltpu.PrefetchScalarGridSpec(
            num_scalar_prefetch=0,
            grid=grid,
            in_specs=[
                pl.BlockSpec((tm, D), lambda i: (i, 0)),   # x tile (pipelined)
                pl.BlockSpec((D, H), lambda i: (0, 0)),    # w1 (resident)
                pl.BlockSpec((1, H), lambda i: (0, 0)),    # b1 (resident)
                pl.BlockSpec((H, A), lambda i: (0, 0)),    # w2 (resident)
                pl.BlockSpec((1, A), lambda i: (0, 0)),    # b2 (resident)
            ],
            # Last block dim == full array dim (num_actions): legal and avoids
            # the 128-lane zero-padding + post-call column slice.
            out_specs=pl.BlockSpec((tm, A), lambda i: (i, 0)),
        ),
        compiler_params=pltpu.CompilerParams(
            dimension_semantics=("parallel",),   # 2-TC sharding on v7x
        ),
        cost_estimate=pl.CostEstimate(
            flops=flops, transcendentals=0, bytes_accessed=bytes_accessed),
    )(xi, w1, b1, w2, b2)

    return out if b_pad == B else out[:B]


def init_params(key, obs_dim, hidden, num_actions):
    """Deterministic init mimicking PyTorch's default Linear init
    (uniform in [-1/sqrt(fan_in), 1/sqrt(fan_in)]). Weights stored bf16."""
    k1, k2, k3, k4 = jax.random.split(key, 4)
    bound1 = 1.0 / jnp.sqrt(obs_dim)
    bound2 = 1.0 / jnp.sqrt(hidden)
    w1 = jax.random.uniform(k1, (obs_dim, hidden), jnp.float32, -bound1, bound1)
    b1 = jax.random.uniform(k2, (1, hidden), jnp.float32, -bound1, bound1)
    w2 = jax.random.uniform(k3, (hidden, num_actions), jnp.float32, -bound2, bound2)
    b2 = jax.random.uniform(k4, (1, num_actions), jnp.float32, -bound2, bound2)
    return w1.astype(jnp.bfloat16), b1, w2.astype(jnp.bfloat16), b2


def _reference(x, w1, b1, w2, b2):
    # Same math in plain JAX, using the bf16-rounded weights/inputs cast to f32.
    x32 = x.astype(jnp.bfloat16).astype(jnp.float32)
    w1_32 = w1.astype(jnp.float32)
    w2_32 = w2.astype(jnp.float32)
    h = jnp.maximum(x32 @ w1_32 + b1, 0.0)
    return h @ w2_32 + b2


if __name__ == "__main__":
    # Shapes consistent with the module: obs_shape=(32,), num_actions=4.
    OBS_DIM, NUM_ACTIONS = 32, 4

    key = jax.random.PRNGKey(0)
    k_x1, k_x2, k_x3, k_p = jax.random.split(key, 4)
    w1, b1, w2, b2 = init_params(k_p, OBS_DIM, HIDDEN, NUM_ACTIONS)

    # Small batch (single grid step on 1-TC chips).
    x1 = jax.random.normal(k_x1, (8, OBS_DIM), jnp.float32)
    o1 = mlp_forward(x1, w1, b1, w2, b2)
    jax.block_until_ready(o1)
    assert o1.shape == (8, NUM_ACTIONS)
    assert jnp.allclose(o1, _reference(x1, w1, b1, w2, b2), atol=1e-2, rtol=1e-2)

    # Multi-tile grid (3 tiles of 128 rows) exercising the pipelined path.
    x2 = jax.random.normal(k_x2, (384, OBS_DIM), jnp.float32)
    o2 = mlp_forward(x2, w1, b1, w2, b2, block_m=128)
    jax.block_until_ready(o2)
    assert o2.shape == (384, NUM_ACTIONS)
    assert jnp.allclose(o2, _reference(x2, w1, b1, w2, b2), atol=1e-2, rtol=1e-2)

    # Batch not a multiple of 8 (exercises the pad + row-slice path, and the
    # 2-step split on 2-TC chips).
    x3 = jax.random.normal(k_x3, (100, OBS_DIM), jnp.float32)
    o3 = mlp_forward(x3, w1, b1, w2, b2)
    jax.block_until_ready(o3)
    assert o3.shape == (100, NUM_ACTIONS)
    assert jnp.allclose(o3, _reference(x3, w1, b1, w2, b2), atol=1e-2, rtol=1e-2)

    print("KERNEL_OK")
</pallas_src>

<mosaic_0001>
module attributes {stable_mosaic.version = 11 : i64} {
  func.func @mlp_kernel(%arg0: i32, %arg1: memref<8x32xf32, #tpu.memory_space<vmem>>, %arg2: memref<32x256xbf16, #tpu.memory_space<vmem>>, %arg3: memref<1x256xf32, #tpu.memory_space<vmem>>, %arg4: memref<256x4xbf16, #tpu.memory_space<vmem>>, %arg5: memref<1x4xf32, #tpu.memory_space<vmem>>, %arg6: memref<8x4xf32, #tpu.memory_space<vmem>>) attributes {dimension_semantics = [#tpu.dimension_semantics<parallel>], iteration_bounds = array<i64: 1>, scalar_prefetch = 0 : i64, scratch_operands = 0 : i64, tpu.core_type = #tpu.core_type<tc>, window_params = [{transform_indices = @transform_0, window_bounds = array<i64: 8, 32>}, {pipeline_mode = #tpu.pipeline_mode<synchronous>, transform_indices = @transform_1, window_bounds = array<i64: 32, 256>}, {pipeline_mode = #tpu.pipeline_mode<synchronous>, transform_indices = @transform_2, window_bounds = array<i64: 1, 256>}, {pipeline_mode = #tpu.pipeline_mode<synchronous>, transform_indices = @transform_3, window_bounds = array<i64: 256, 4>}, {pipeline_mode = #tpu.pipeline_mode<synchronous>, transform_indices = @transform_4, window_bounds = array<i64: 1, 4>}, {transform_indices = @transform_5, window_bounds = array<i64: 8, 4>}]} {
    %c0 = arith.constant 0 : index
    %c0_0 = arith.constant 0 : index
    %0 = vector.load %arg1[%c0, %c0_0] : memref<8x32xf32, #tpu.memory_space<vmem>>, vector<8x32xf32>
    %1 = arith.truncf %0 : vector<8x32xf32> to vector<8x32xbf16>
    %c0_1 = arith.constant 0 : index
    %c0_2 = arith.constant 0 : index
    %2 = vector.load %arg2[%c0_1, %c0_2] : memref<32x256xbf16, #tpu.memory_space<vmem>>, vector<32x256xbf16>
    %cst = arith.constant dense<0.000000e+00> : vector<8x256xf32>
    %3 = tpu.matmul %1, %2, %cst {dimension_numbers = #tpu.dot_dimension_numbers<[1], [0], [0], [1], [0, 0, 1, 1], [], []>} : vector<8x32xbf16>, vector<32x256xbf16>, vector<8x256xf32> -> vector<8x256xf32>
    %c0_3 = arith.constant 0 : index
    %c0_4 = arith.constant 0 : index
    %4 = vector.load %arg3[%c0_3, %c0_4] : memref<1x256xf32, #tpu.memory_space<vmem>>, vector<1x256xf32>
    %5 = vector.broadcast %4 : vector<1x256xf32> to vector<8x256xf32>
    %6 = arith.addf %3, %5 : vector<8x256xf32>
    %cst_5 = arith.constant 0.000000e+00 : f32
    %7 = vector.broadcast %cst_5 : f32 to vector<8x256xf32>
    %8 = arith.maximumf %6, %7 : vector<8x256xf32>
    %9 = arith.truncf %8 : vector<8x256xf32> to vector<8x256xbf16>
    %c0_6 = arith.constant 0 : index
    %c0_7 = arith.constant 0 : index
    %10 = vector.load %arg4[%c0_6, %c0_7] : memref<256x4xbf16, #tpu.memory_space<vmem>>, vector<256x4xbf16>
    %cst_8 = arith.constant dense<0.000000e+00> : vector<8x4xf32>
    %11 = tpu.matmul %9, %10, %cst_8 {dimension_numbers = #tpu.dot_dimension_numbers<[1], [0], [0], [1], [0, 0, 1, 1], [], []>} : vector<8x256xbf16>, vector<256x4xbf16>, vector<8x4xf32> -> vector<8x4xf32>
    %c0_9 = arith.constant 0 : index
    %c0_10 = arith.constant 0 : index
    %12 = vector.load %arg5[%c0_9, %c0_10] : memref<1x4xf32, #tpu.memory_space<vmem>>, vector<1x4xf32>
    %13 = vector.broadcast %12 : vector<1x4xf32> to vector<8x4xf32>
    %14 = arith.addf %11, %13 : vector<8x4xf32>
    %c0_11 = arith.constant 0 : index
    %c0_12 = arith.constant 0 : index
    %15 = vector.load %arg6[%c0_11, %c0_12] : memref<8x4xf32, #tpu.memory_space<vmem>>, vector<8x4xf32>
    tpu.vector_store %arg6[%c0_11, %c0_12], %14 {strides = array<i32>} : memref<8x4xf32, #tpu.memory_space<vmem>>, vector<8x4xf32>,
    return
  }
  func.func @transform_0(%arg0: i32) -> (i32, i32) {
    %c0_i32 = arith.constant 0 : i32
    %c0_i32_0 = arith.constant 0 : i32
    return %arg0, %c0_i32 : i32, i32
  }
  func.func @transform_1(%arg0: i32) -> (i32, i32) {
    %c0_i32 = arith.constant 0 : i32
    %c0_i32_0 = arith.constant 0 : i32
    %c0_i32_1 = arith.constant 0 : i32
    return %c0_i32, %c0_i32_0 : i32, i32
  }
  func.func @transform_2(%arg0: i32) -> (i32, i32) {
    %c0_i32 = arith.constant 0 : i32
    %c0_i32_0 = arith.constant 0 : i32
    %c0_i32_1 = arith.constant 0 : i32
    return %c0_i32, %c0_i32_0 : i32, i32
  }
  func.func @transform_3(%arg0: i32) -> (i32, i32) {
    %c0_i32 = arith.constant 0 : i32
    %c0_i32_0 = arith.constant 0 : i32
    %c0_i32_1 = arith.constant 0 : i32
    return %c0_i32, %c0_i32_0 : i32, i32
  }
  func.func @transform_4(%arg0: i32) -> (i32, i32) {
    %c0_i32 = arith.constant 0 : i32
    %c0_i32_0 = arith.constant 0 : i32
    %c0_i32_1 = arith.constant 0 : i32
    return %c0_i32, %c0_i32_0 : i32, i32
  }
  func.func @transform_5(%arg0: i32) -> (i32, i32) {
    %c0_i32 = arith.constant 0 : i32
    %c0_i32_0 = arith.constant 0 : i32
    return %arg0, %c0_i32 : i32, i32
  }
}

</mosaic_0001>

<bundles_post_ra>
// kernel: mlp_forward.1
= control target key start
LH: loop header
LB: loop body
LE: loop exit
PB: predicated region body
PF: predicated region fallthrough
CT: control target
= control target key end

     0   :  { %v356_v1 = vmov 0   ;;  %vm59_vm0 = vcmask 261120   ;;  %v29_v23 = vlaneseq  ;;  %vm283_vm1 = vcmask 31744   ;;  %s459_s1 = inlined_call_operand.vmem [shape: bf16[32,256], index: 1, kind: input, shape index: {}]   ;;  %s460_s0 = inlined_call_operand.vmem [shape: f32[8,32], index: 0, kind: input, shape index: {}]   ;;  %s461_s3 = inlined_call_operand.vmem [shape: bf16[256,4], index: 3, kind: input, shape index: {}]   ;;  %s462_s2 = inlined_call_operand.vmem [shape: f32[1,256], index: 2, kind: input, shape index: {}]   ;;  %s463_s4 = inlined_call_operand.vmem [shape: f32[1,4], index: 4, kind: input, shape index: {}]   ;;  %s464_s5 = inlined_call_operand.vmem [shape: f32[8,4], index: 5, kind: output, shape index: {}]  }
   0x1   :  { %v334_v0 = vld [vmem:[%s459_s1 + $0x14] ss:$8 sps:$4 sm:$0xff]   ;;  %95 = vmatprep.mubr.bf16.mxu0 %v356_v1  ;;  %v336_v2 = vld [vmem:[%s459_s1 + $0x10] ss:$8 sps:$4 sm:$0xff]   ;;  %v337_v3 = vld [vmem:[%s459_s1 + $0x4] ss:$8 sps:$4 sm:$0xff]  }
   0x2   :  { %75 = vmatprep.subr.bf16.mxu0 %v334_v0  ;;  %v339_v4 = vld [vmem:[%s459_s1] ss:$8 sps:$4 sm:$0xff]   ;;  %v340_v6 = vld [vmem:[%s461_s3 + $0x78] sm:$0xff]   ;;  %v342_v8 = vld [vmem:[%s461_s3 + $0x70] sm:$0xff]   ;;  %v30_v24 = vshrl.u32 %v29_v23, 7 }
   0x3   :  { %v21_v5 = vld [vmem:[%s460_s0] sm:$0xff]  ;;  %76 = vmatpush1.bf16.msra.mxu0 %v336_v2  ;;  %v341_v7 = vld [vmem:[%s461_s3 + $0x38] sm:$0xff]   ;;  %311 = vmatprep.subr.bf16.mxu1 %v340_v6  ;;  %v343_v10 = vld [vmem:[%s461_s3 + $0x30] sm:$0xff]  }
   0x4   :  { %77 = vmatprep.subr.bf16.mxu0 %v337_v3  ;;  %v22_v9 = vpack.c.bf16 %v21_v5, %v21_v5  ;;  %312 = vmatpush3.bf16.msra.mxu1 %v341_v7  ;;  %v344_v11 = vld [vmem:[%s461_s3 + $0x68] sm:$0xff]   ;;  %v346_v13 = vld [vmem:[%s461_s3 + $0x60] sm:$0xff]   ;;  %v348_v15 = vld [vmem:[%s461_s3 + $0x58] sm:$0xff]   ;;  %v31_v25 = vsub.s32 0, %v30_v24  ;;  %v35_v27 = vsub.s32 1, %v30_v24 }
   0x5   :  { %313 = vmatprep.subr.bf16.mxu1 %v342_v8  ;;  %v345_v12 = vld [vmem:[%s461_s3 + $0x28] sm:$0xff]   ;;  %v347_v14 = vld [vmem:[%s461_s3 + $0x20] sm:$0xff]   ;;  %v349_v16 = vld [vmem:[%s461_s3 + $0x18] sm:$0xff]  }
   0x6   :  { %v350_v17 = vld [vmem:[%s461_s3 + $0x50] sm:$0xff]   ;;  %v352_v19 = vld [vmem:[%s461_s3 + $0x48] sm:$0xff]   ;;  %v354_v21 = vld [vmem:[%s461_s3 + $0x40] sm:$0xff]  }
   0x7   :  { %78 = vmatpush1.bf16.msra.mxu0 %v339_v4  ;;  %v351_v18 = vld [vmem:[%s461_s3 + $0x10] sm:$0xff]   ;;  %v353_v20 = vld [vmem:[%s461_s3 + $0x8] sm:$0xff]   ;;  %v355_v22 = vld [vmem:[%s461_s3] sm:$0xff]  }
   0x8   :  { %314 = vmatpush3.bf16.msra.mxu1 %v343_v10  ;;  %v27_v26 = vld [vmem:[%s462_s2] sm:$0x3] }
   0x9   :  { %315 = vmatprep.subr.bf16.mxu1 %v344_v11  ;;  %v32_v28 = vrot.slane %v27_v26, %v31_v25  ;;  %v36_v29 = vrot.slane %v27_v26, %v35_v27  ;;  %v294_v41 = vld [vmem:[%s463_s4] ss:$0 sm:$0xff] }
   0xa   :  { %293 = vmatmul.mubr.msk.bf16.vlgmr.msra.gmra.mxu0 %vm59_vm0, %v22_v9 }
   0xc   :  { %316 = vmatpush3.bf16.msra.mxu1 %v345_v12 }
   0xd   :  { %317 = vmatprep.subr.bf16.mxu1 %v346_v13 }
  0x10   :  { %318 = vmatpush3.bf16.msra.mxu1 %v347_v14 }
  0x11   :  { %319 = vmatprep.subr.bf16.mxu1 %v348_v15 }
  0x14   :  { %320 = vmatpush3.bf16.msra.mxu1 %v349_v16 }
  0x15   :  { %321 = vmatprep.subr.bf16.mxu1 %v350_v17 }
  0x18   :  { %322 = vmatpush3.bf16.msra.mxu1 %v351_v18 }
  0x19   :  { %323 = vmatprep.subr.bf16.mxu1 %v352_v19 }
  0x1c   :  { %324 = vmatpush3.bf16.msra.mxu1 %v353_v20 }
  0x1d   :  { %325 = vmatprep.subr.bf16.mxu1 %v354_v21 }
  0x20   :  { %326 = vmatpush3.bf16.msra.mxu1 %v355_v22 }
  0xca   :  { %v97_v30 = vpop.f32.mrf.mxu0 }
  0xcb   :  { %v98_v31 = vadd.f32 %v97_v30, %v32_v28 }
  0xcc   :  { %v99_v32 = vpop.f32.mrf.mxu0 }
  0xcd   :  { %v100_v33 = vadd.f32 %v99_v32, %v36_v29  ;;  %v104_v34 = vmax.f32 %v98_v31, 0.0 }
  0xce   :  { %v101_v35 = vpop.f32.mrf.mxu0 }
  0xcf   :  { %v105_v36 = vmax.f32 %v100_v33, 0.0  ;;  %v106_v39 = vpack.c.bf16 %v104_v34, %v104_v34 }
  0xd0   :  { %v102_v37 = vpop.f32.mrf.mxu0 }
  0xd1   :  { %v107_v38 = vpack.c.bf16 %v105_v36, %v105_v36 }
  0xd3   :  { %275 = vmatprep.mubr.bf16.mxu1 %v107_v38 }
  0xd4   :  { %276 = vmatmul.mubr.bf16.vlgmr.msra.gmra.mxu1 %v106_v39 }
 0x194   :  { %v327_v40 = vpop.f32.mrf.mxu1 }
 0x196   :  { %v328_v42 = vpop.f32.mrf.mxu1 }
 0x197   :  { %v329_v43 = vadd.f32 %v328_v42, %v327_v40 }
 0x198   :  { %v330_v44 = vpop.f32.mrf.mxu1 }
 0x199   :  { %v278_v45 = vadd.f32 %v329_v43, %v294_v41 }
 0x19a   :  { %v331_v46 = vpop.f32.mrf.mxu1 }
 0x19b   :  { %284 = vst.msk [vmem:[%s464_s5] sm:$0xff] %vm283_vm1, %v278_v45 }

</bundles_post_ra>
